<compile_context>
chip_gen: v7x
topology: tpu7x:2x2x1
jax: 0.10.0
libtpu: 0.0.40
codegen_flags: <defaults>
</compile_context>

<pallas_src>
import jax
import jax.numpy as jnp
from jax import lax
from jax.experimental import pallas as pl
from jax.experimental.pallas import tpu as pltpu


def _mlp_kernel(x_ref, w1_ref, w2_ref, w3_ref, c_ref, o_ref):
    # x_ref: (Bt, D) batch-major tile, straight from the original HBM array.
    x = x_ref[...]

    # Packed constants: col0=b1(64), col1=b2(32), col2=b3(16), col3=w4(16),
    # col4[0]=b4.  Static ref slices -> no runtime cost.
    b1 = c_ref[:, 0:1]          # (64, 1)
    b2 = c_ref[0:32, 1:2]       # (32, 1)
    b3 = c_ref[0:16, 2:3]       # (16, 1)
    w4 = c_ref[0:16, 3:4]       # (16, 1)
    b4 = c_ref[0:1, 4:5]        # (1, 1)

    # Layer 1: contract the feature dim of both operands -> (64, Bt).
    # Batch stays on lanes for every layer, so matmul N is the lane-dense
    # batch tile instead of the tiny 64/32/16 output widths.
    # (For strict fp32 parity at large D, precision=lax.Precision.HIGHEST
    # could be added; the kernel is HBM-bound so the extra MXU passes are free.)
    h1 = lax.dot_general(
        w1_ref[...], x,
        dimension_numbers=(((1,), (1,)), ((), ())),
        preferred_element_type=jnp.float32) + b1
    h1 = jnp.maximum(h1, 0.0)

    # Layer 2: (32, 64) @ (64, Bt) -> (32, Bt)
    h2 = jnp.dot(w2_ref[...], h1, preferred_element_type=jnp.float32) + b2
    h2 = jnp.maximum(h2, 0.0)

    # Layer 3: (16, 32) @ (32, Bt) -> (16, Bt)
    h3 = jnp.dot(w3_ref[...], h2, preferred_element_type=jnp.float32) + b3
    h3 = jnp.maximum(h3, 0.0)

    # Output layer 16 -> 1: broadcast-mul + sublane reduction (VPU/XLU slack)
    # instead of a padded MXU pass for a width-1 result.
    out = jnp.sum(h3 * w4, axis=0, keepdims=True) + b4
    o_ref[...] = out.astype(o_ref.dtype)


def _round_up(n, m):
    return ((n + m - 1) // m) * m


def _choose_batch_tile(B, D):
    lane = 128
    # ~4 MiB of x per block so per-grid-step overhead (~0.35 us) is amortized;
    # cap rows so the f32 (64, Bt) intermediate stays small.
    tile = ((4 << 20) // (D * 4)) // lane * lane
    tile = max(lane, min(tile, 16384))
    # Keep >= 2 grid steps when the batch allows so the "parallel" batch axis
    # can shard across v7x's two TensorCores.
    bp = _round_up(B, lane)
    if bp >= 2 * lane:
        tile = min(tile, max(lane, (bp // 2) // lane * lane))
    return tile


def reference_forward(x, params):
    h = jnp.maximum(x @ params["w1"].T + params["b1"], 0.0)
    h = jnp.maximum(h @ params["w2"].T + params["b2"], 0.0)
    h = jnp.maximum(h @ params["w3"].T + params["b3"], 0.0)
    return h @ params["w4"].T + params["b4"]


def rul_predictor_forward(x, params, *, batch_tile=None, min_pallas_batch=1024):
    """x: (B, n_hidden_lstm) f32.

    params: torch-layout weights w1..w4 with shape (out, in), biases b1..b4
    with shape (out,).
    """
    B, D = x.shape

    # At small batch the pallas_call fixed cost dominates; let plain XLA
    # handle it unless the caller forces the kernel path.
    if B < min_pallas_batch:
        return reference_forward(x, params)

    w1, b1 = params["w1"], params["b1"]
    w2, b2 = params["w2"], params["b2"]
    w3, b3 = params["w3"], params["b3"]
    w4, b4 = params["w4"], params["b4"]

    lane = 128
    if batch_tile is None:
        tile = _choose_batch_tile(B, D)
    else:
        tile = max(lane, (int(batch_tile) // lane) * lane)

    # Pack biases, the 16->1 weight column and the scalar output bias into a
    # single tiny VMEM operand (fetched once).
    consts = jnp.zeros((64, 5), w1.dtype)
    consts = consts.at[:, 0].set(b1)
    consts = consts.at[:32, 1].set(b2)
    consts = consts.at[:16, 2].set(b3)
    consts = consts.at[:16, 3].set(w4.reshape(-1))
    consts = consts.at[0, 4].set(b4[0])

    n_full = B // tile
    if n_full == 0:
        # Batch smaller than one tile: pad up to a single lane-aligned tile.
        tile = _round_up(B, lane)
        x_main = jnp.pad(x, ((0, tile - B), (0, 0)))
        n_full, main_rows, valid_main = 1, tile, B
    else:
        # Full tiles stream straight from the original array (no pad, no
        # transpose); the grid simply does not cover the ragged tail.
        x_main = x
        main_rows = n_full * tile
        valid_main = main_rows

    def full_spec(arr):
        # Tiny constant blocks: whole array, constant index -> fetched once.
        return pl.BlockSpec(arr.shape, lambda i: (0,) * arr.ndim)

    weight_bytes = sum(int(a.size) * a.dtype.itemsize
                       for a in (w1, w2, w3, consts))
    cost = pl.CostEstimate(
        flops=2 * main_rows * (D * 64 + 64 * 32 + 32 * 16 + 16),
        transcendentals=0,
        bytes_accessed=main_rows * D * 4 + main_rows * 4 + weight_bytes,
    )

    out_main = pl.pallas_call(
        _mlp_kernel,
        out_shape=jax.ShapeDtypeStruct((1, main_rows), x.dtype),
        grid_spec=pltpu.PrefetchScalarGridSpec(
            num_scalar_prefetch=0,
            grid=(n_full,),
            in_specs=[
                pl.BlockSpec((tile, D), lambda i: (i, 0)),
                full_spec(w1), full_spec(w2), full_spec(w3), full_spec(consts),
            ],
            out_specs=pl.BlockSpec((1, tile), lambda i: (0, i)),
        ),
        compiler_params=pltpu.CompilerParams(
            dimension_semantics=("parallel",),
            vmem_limit_bytes=32 * 1024 * 1024,
        ),
        cost_estimate=cost,
    )(x_main, w1, w2, w3, consts)

    out = out_main[0, :valid_main].reshape(valid_main, 1)
    rem = B - valid_main
    if rem > 0:
        # Ragged tail (< one tile): finish with the tiny pure-JAX path instead
        # of padding/copying the whole x array.
        out = jnp.concatenate([out, reference_forward(x[valid_main:], params)],
                              axis=0)
    return out


def init_params(key, n_hidden_lstm):
    # Deterministic synthetic init (torch Linear layout: W (out, in), b (out,)).
    dims = [(n_hidden_lstm, 64), (64, 32), (32, 16), (16, 1)]
    params = {}
    keys = jax.random.split(key, 2 * len(dims))
    for idx, (d_in, d_out) in enumerate(dims):
        bound = 1.0 / (d_in ** 0.5)
        w = jax.random.uniform(keys[2 * idx], (d_out, d_in),
                               minval=-bound, maxval=bound, dtype=jnp.float32)
        b = jax.random.uniform(keys[2 * idx + 1], (d_out,),
                               minval=-bound, maxval=bound, dtype=jnp.float32)
        params[f"w{idx + 1}"] = w
        params[f"b{idx + 1}"] = b
    return params


if __name__ == "__main__":
    n_hidden_lstm = 32
    key = jax.random.PRNGKey(0)
    kx, kp, kx2 = jax.random.split(key, 3)
    params = init_params(kp, n_hidden_lstm)

    # Small demo batch: force the Pallas path (min_pallas_batch=0).
    batch = 8
    x = jax.random.normal(kx, (batch, n_hidden_lstm), dtype=jnp.float32)
    out = rul_predictor_forward(x, params, min_pallas_batch=0)
    out = jax.block_until_ready(out)
    ref = reference_forward(x, params)
    assert out.shape == (batch, 1), out.shape
    assert jnp.allclose(out, ref, atol=1e-4, rtol=1e-4), (out, ref)

    # Ragged batch: exercises the no-pad full-tile kernel path + JAX tail.
    batch2 = 300
    x2 = jax.random.normal(kx2, (batch2, n_hidden_lstm), dtype=jnp.float32)
    out2 = jax.block_until_ready(
        rul_predictor_forward(x2, params, min_pallas_batch=0))
    ref2 = reference_forward(x2, params)
    assert out2.shape == (batch2, 1), out2.shape
    assert jnp.allclose(out2, ref2, atol=1e-4, rtol=1e-4)

    print("KERNEL_OK")
</pallas_src>

<mosaic_0001>
module attributes {stable_mosaic.version = 11 : i64} {
  func.func @_mlp_kernel(%arg0: i32, %arg1: memref<128x32xf32, #tpu.memory_space<vmem>>, %arg2: memref<64x32xf32, #tpu.memory_space<vmem>>, %arg3: memref<32x64xf32, #tpu.memory_space<vmem>>, %arg4: memref<16x32xf32, #tpu.memory_space<vmem>>, %arg5: memref<64x5xf32, #tpu.memory_space<vmem>>, %arg6: memref<1x128xf32, #tpu.memory_space<vmem>>) attributes {dimension_semantics = [#tpu.dimension_semantics<parallel>], iteration_bounds = array<i64: 1>, scalar_prefetch = 0 : i64, scratch_operands = 0 : i64, tpu.core_type = #tpu.core_type<tc>, window_params = [{transform_indices = @transform_0, window_bounds = array<i64: 128, 32>}, {pipeline_mode = #tpu.pipeline_mode<synchronous>, transform_indices = @transform_1, window_bounds = array<i64: 64, 32>}, {pipeline_mode = #tpu.pipeline_mode<synchronous>, transform_indices = @transform_2, window_bounds = array<i64: 32, 64>}, {pipeline_mode = #tpu.pipeline_mode<synchronous>, transform_indices = @transform_3, window_bounds = array<i64: 16, 32>}, {pipeline_mode = #tpu.pipeline_mode<synchronous>, transform_indices = @transform_4, window_bounds = array<i64: 64, 5>}, {transform_indices = @transform_5, window_bounds = array<i64: 1, 128>}]} {
    %c0 = arith.constant 0 : index
    %c0_0 = arith.constant 0 : index
    %0 = vector.load %arg1[%c0, %c0_0] : memref<128x32xf32, #tpu.memory_space<vmem>>, vector<128x32xf32>
    %c0_1 = arith.constant 0 : index
    %c0_2 = arith.constant 0 : index
    %1 = vector.load %arg5[%c0_1, %c0_2] : memref<64x5xf32, #tpu.memory_space<vmem>>, vector<64x1xf32>
    %c0_3 = arith.constant 0 : index
    %c1 = arith.constant 1 : index
    %2 = vector.load %arg5[%c0_3, %c1] : memref<64x5xf32, #tpu.memory_space<vmem>>, vector<32x1xf32>
    %c0_4 = arith.constant 0 : index
    %c2 = arith.constant 2 : index
    %3 = vector.load %arg5[%c0_4, %c2] : memref<64x5xf32, #tpu.memory_space<vmem>>, vector<16x1xf32>
    %c0_5 = arith.constant 0 : index
    %c3 = arith.constant 3 : index
    %4 = vector.load %arg5[%c0_5, %c3] : memref<64x5xf32, #tpu.memory_space<vmem>>, vector<16x1xf32>
    %c0_6 = arith.constant 0 : index
    %c4 = arith.constant 4 : index
    %5 = vector.load %arg5[%c0_6, %c4] : memref<64x5xf32, #tpu.memory_space<vmem>>, vector<1x1xf32>
    %c0_7 = arith.constant 0 : index
    %c0_8 = arith.constant 0 : index
    %6 = vector.load %arg2[%c0_7, %c0_8] : memref<64x32xf32, #tpu.memory_space<vmem>>, vector<64x32xf32>
    %cst = arith.constant dense<0.000000e+00> : vector<64x128xf32>
    %7 = tpu.matmul %6, %0, %cst {dimension_numbers = #tpu.dot_dimension_numbers<[1], [1], [0], [0], [0, 0, 1, 0], [], []>} : vector<64x32xf32>, vector<128x32xf32>, vector<64x128xf32> -> vector<64x128xf32>
    %8 = vector.broadcast %1 : vector<64x1xf32> to vector<64x128xf32>
    %9 = arith.addf %7, %8 : vector<64x128xf32>
    %cst_9 = arith.constant 0.000000e+00 : f32
    %10 = vector.broadcast %cst_9 : f32 to vector<64x128xf32>
    %11 = arith.maximumf %9, %10 : vector<64x128xf32>
    %c0_10 = arith.constant 0 : index
    %c0_11 = arith.constant 0 : index
    %12 = vector.load %arg3[%c0_10, %c0_11] : memref<32x64xf32, #tpu.memory_space<vmem>>, vector<32x64xf32>
    %cst_12 = arith.constant dense<0.000000e+00> : vector<32x128xf32>
    %13 = tpu.matmul %12, %11, %cst_12 {dimension_numbers = #tpu.dot_dimension_numbers<[1], [0], [0], [1], [0, 0, 1, 1], [], []>} : vector<32x64xf32>, vector<64x128xf32>, vector<32x128xf32> -> vector<32x128xf32>
    %14 = vector.broadcast %2 : vector<32x1xf32> to vector<32x128xf32>
    %15 = arith.addf %13, %14 : vector<32x128xf32>
    %cst_13 = arith.constant 0.000000e+00 : f32
    %16 = vector.broadcast %cst_13 : f32 to vector<32x128xf32>
    %17 = arith.maximumf %15, %16 : vector<32x128xf32>
    %c0_14 = arith.constant 0 : index
    %c0_15 = arith.constant 0 : index
    %18 = vector.load %arg4[%c0_14, %c0_15] : memref<16x32xf32, #tpu.memory_space<vmem>>, vector<16x32xf32>
    %cst_16 = arith.constant dense<0.000000e+00> : vector<16x128xf32>
    %19 = tpu.matmul %18, %17, %cst_16 {dimension_numbers = #tpu.dot_dimension_numbers<[1], [0], [0], [1], [0, 0, 1, 1], [], []>} : vector<16x32xf32>, vector<32x128xf32>, vector<16x128xf32> -> vector<16x128xf32>
    %20 = vector.broadcast %3 : vector<16x1xf32> to vector<16x128xf32>
    %21 = arith.addf %19, %20 : vector<16x128xf32>
    %cst_17 = arith.constant 0.000000e+00 : f32
    %22 = vector.broadcast %cst_17 : f32 to vector<16x128xf32>
    %23 = arith.maximumf %21, %22 : vector<16x128xf32>
    %24 = vector.broadcast %4 : vector<16x1xf32> to vector<16x128xf32>
    %25 = arith.mulf %23, %24 : vector<16x128xf32>
    %cst_18 = arith.constant dense<0.000000e+00> : vector<128xf32>
    %26 = vector.multi_reduction <add>, %25, %cst_18 [0] : vector<16x128xf32> to vector<128xf32>
    %27 = vector.shape_cast %26 : vector<128xf32> to vector<1x128xf32>
    %28 = vector.broadcast %5 : vector<1x1xf32> to vector<1x128xf32>
    %29 = arith.addf %27, %28 : vector<1x128xf32>
    %c0_19 = arith.constant 0 : index
    %c0_20 = arith.constant 0 : index
    %30 = vector.load %arg6[%c0_19, %c0_20] : memref<1x128xf32, #tpu.memory_space<vmem>>, vector<1x128xf32>
    tpu.vector_store %arg6[%c0_19, %c0_20], %29 {strides = array<i32>} : memref<1x128xf32, #tpu.memory_space<vmem>>, vector<1x128xf32>,
    return
  }
  func.func @transform_0(%arg0: i32) -> (i32, i32) {
    %c0_i32 = arith.constant 0 : i32
    %c0_i32_0 = arith.constant 0 : i32
    return %arg0, %c0_i32 : i32, i32
  }
  func.func @transform_1(%arg0: i32) -> (i32, i32) {
    %c0_i32 = arith.constant 0 : i32
    %c0_i32_0 = arith.constant 0 : i32
    %c0_i32_1 = arith.constant 0 : i32
    return %c0_i32, %c0_i32_0 : i32, i32
  }
  func.func @transform_2(%arg0: i32) -> (i32, i32) {
    %c0_i32 = arith.constant 0 : i32
    %c0_i32_0 = arith.constant 0 : i32
    %c0_i32_1 = arith.constant 0 : i32
    return %c0_i32, %c0_i32_0 : i32, i32
  }
  func.func @transform_3(%arg0: i32) -> (i32, i32) {
    %c0_i32 = arith.constant 0 : i32
    %c0_i32_0 = arith.constant 0 : i32
    %c0_i32_1 = arith.constant 0 : i32
    return %c0_i32, %c0_i32_0 : i32, i32
  }
  func.func @transform_4(%arg0: i32) -> (i32, i32) {
    %c0_i32 = arith.constant 0 : i32
    %c0_i32_0 = arith.constant 0 : i32
    %c0_i32_1 = arith.constant 0 : i32
    return %c0_i32, %c0_i32_0 : i32, i32
  }
  func.func @transform_5(%arg0: i32) -> (i32, i32) {
    %c0_i32 = arith.constant 0 : i32
    %c0_i32_0 = arith.constant 0 : i32
    return %c0_i32, %arg0 : i32, i32
  }
}

</mosaic_0001>

<bundles_post_ra>
// kernel: tpu_custom_call.1
= control target key start
LH: loop header
LB: loop body
LE: loop exit
PB: predicated region body
PF: predicated region fallthrough
CT: control target
= control target key end

     0   :  { %vm94_vm0 = vcmask 261120   ;;  %v792_v6 = vmov 0   ;;  %s1025_s0 = inlined_call_operand.vmem [shape: f32[128,32], index: 0, kind: input, shape index: {}]   ;;  %s1026_s1 = inlined_call_operand.vmem [shape: f32[64,32], index: 1, kind: input, shape index: {}]   ;;  %s1027_s2 = inlined_call_operand.vmem [shape: f32[32,64], index: 2, kind: input, shape index: {}]   ;;  %s1028_s3 = inlined_call_operand.vmem [shape: f32[16,32], index: 3, kind: input, shape index: {}]   ;;  %s1029_s4 = inlined_call_operand.vmem [shape: f32[64,5], index: 4, kind: input, shape index: {}]   ;;  %s1030_s5 = inlined_call_operand.hbm [shape: f32[1,128], index: 5, kind: output, shape index: {}]  }
   0x1   :  { %v21_v0 = vld [vmem:[%s1025_s0] sm:$0xff]  ;;  %v22_v1 = vld [vmem:[%s1025_s0 + $0x8] sm:$0xff]  ;;  %v23_v2 = vld [vmem:[%s1025_s0 + $0x10] sm:$0xff]  ;;  %760 = vset.pattern.permute.xlu0 %v792_v6  ;;  %761 = vset.pattern.permute.xlu1 %v792_v6 }
   0x2   :  { %v682_v3 = vpack.c.bf16 %v22_v1, %v21_v0  ;;  %vm839_vm1 = vmpackc.low %vm94_vm0, %vm94_vm0  ;;  %v24_v5 = vld [vmem:[%s1025_s0 + $0x18] sm:$0xff]  ;;  %v46_v8 = vld [vmem:[%s1026_s1] sm:$0xff] }
   0x3   :  { %v688_v7 = vpack.c.bf16 %v24_v5, %v23_v2  ;;  %v25_v9 = vld [vmem:[%s1025_s0 + $0x20] sm:$0xff]  ;;  %v26_v10 = vld [vmem:[%s1025_s0 + $0x28] sm:$0xff]  ;;  %637 = vmatprep.mubr.msk.f32.mxu0 %vm94_vm0, %v46_v8  ;;  %v870_v12 = vld [vmem:[%s1029_s4 + $0x10] sm:$0xff] }
   0x4   :  { %684 = vmatprep.subr.msk.bf16.mxu0 %vm839_vm1, %v682_v3  ;;  %v865_v11 = vld [vmem:[%s1029_s4] sm:$0xff]  ;;  %v694_v13 = vpack.c.bf16 %v26_v10, %v25_v9  ;;  %66 = vperm.xlu1 %761, %v870_v12   ;;  %v877_v14 = vld [vmem:[%s1029_s4 + $0x8] sm:$0xff]  ;;  %v40_v15 = vld [vmem:[%s1029_s4 + $0x18] sm:$0xff] }
   0x5   :  { %687 = vmatpush3.bf16.xpose.msk.msra.mxu0 %vm839_vm1, %v682_v3  ;;  %56 = vperm.xlu0 %760, %v865_v11  }
   0x6   :  { %690 = vmatprep.subr.msk.bf16.mxu0 %vm839_vm1, %v688_v7 }
   0x7   :  { %10 = vsyncpa [#allocation3], 0  ;;  %v27_v16 = vld [vmem:[%s1025_s0 + $0x30] sm:$0xff]  ;;  %v28_v17 = vld [vmem:[%s1025_s0 + $0x38] sm:$0xff]  ;;  %vm300_vm2 = vcmask 523264   ;;  %v793_v43 = vmov 1  }
   0x8   :  { %71 = vperm.xlu1 %761, %v40_v15   ;;  %v41_v18 = vld [vmem:[%s1029_s4 + $0x20] sm:$0xff]  ;;  %v42_v19 = vld [vmem:[%s1029_s4 + $0x28] sm:$0xff]  ;;  %v700_v20 = vpack.c.bf16 %v28_v17, %v27_v16  ;;  %v43_v21 = vld [vmem:[%s1029_s4 + $0x30] sm:$0xff] }
   0x9   :  { %61 = vperm.xlu0 %760, %v877_v14   ;;  %v44_v22 = vld [vmem:[%s1029_s4 + $0x38] sm:$0xff]  ;;  %v29_v23 = vld [vmem:[%s1025_s0 + $0x40] sm:$0xff]  ;;  %v30_v24 = vld [vmem:[%s1025_s0 + $0x48] sm:$0xff] }
   0xa   :  { %v706_v25 = vpack.c.bf16 %v30_v24, %v29_v23  ;;  %v31_v26 = vld [vmem:[%s1025_s0 + $0x50] sm:$0xff]  ;;  %v32_v27 = vld [vmem:[%s1025_s0 + $0x58] sm:$0xff]  ;;  %v33_v29 = vld [vmem:[%s1025_s0 + $0x60] sm:$0xff]  ;;  %v795_v24 = vmov 3  }
   0xb   :  { %v712_v28 = vpack.c.bf16 %v32_v27, %v31_v26  ;;  %v34_v30 = vld [vmem:[%s1025_s0 + $0x68] sm:$0xff]  ;;  %v35_v32 = vld [vmem:[%s1025_s0 + $0x70] sm:$0xff]  ;;  %v36_v33 = vld [vmem:[%s1025_s0 + $0x78] sm:$0xff] }
   0xc   :  { %81 = vperm.xlu1 %761, %v42_v19   ;;  %v718_v31 = vpack.c.bf16 %v34_v30, %v33_v29  ;;  %v724_v34 = vpack.c.bf16 %v36_v33, %v35_v32  ;;  %v47_v35 = vld [vmem:[%s1026_s1 + $0x8] sm:$0xff]  ;;  %v48_v36 = vld [vmem:[%s1026_s1 + $0x10] sm:$0xff]  ;;  %v49_v37 = vld [vmem:[%s1026_s1 + $0x18] sm:$0xff] }
   0xd   :  { %693 = vmatpush3.bf16.xpose.msk.msra.mxu0 %vm839_vm1, %v688_v7  ;;  %76 = vperm.xlu0 %760, %v41_v18   ;;  %v50_v38 = vld [vmem:[%s1026_s1 + $0x20] sm:$0xff]  ;;  %v51_v39 = vld [vmem:[%s1026_s1 + $0x28] sm:$0xff]  ;;  %v52_v40 = vld [vmem:[%s1026_s1 + $0x30] sm:$0xff] }
   0xe   :  { %696 = vmatprep.subr.msk.bf16.mxu0 %vm839_vm1, %v694_v13  ;;  %v53_v41 = vld [vmem:[%s1026_s1 + $0x38] sm:$0xff]  ;;  %v280_v42 = vld [vmem:[%s1027_s2] sm:$0xff]  ;;  %v281_v18 = vld [vmem:[%s1027_s2 + $0x8] sm:$0xff] }
   0xf   :  { %665 = vmatprep.mubr.msk.f32.mxu1 %vm300_vm2, %v280_v42  ;;  %v282_v19 = vld [vmem:[%s1027_s2 + $0x10] sm:$0xff]  ;;  %v45_v23 = vld [vmem:[%s1029_s4] sm:$0x1]  ;;  %v403_v42 = vld [vmem:[%s1028_s3 + $0x8] sm:$0xff] }
  0x10   :  { %91 = vperm.xlu1 %761, %v44_v22   ;;  %v794_v22 = vmov 2  }
  0x11   :  { %86 = vperm.xlu0 %760, %v43_v21   ;;  %v402_v21 = vld [vmem:[%s1028_s3] sm:$0xff]  ;;  %s797_s3 = smov [#allocation2]  }
  0x12   :  { %s525_s17 = sshll.u32 %s797_s3, 4  ;;  %s526_s17 = int_to_ptr.vmem [resolvable:$true] %s525_s17 }
  0x13   :  { %s768_s18 = scalar_lea.vmem %s526_s17, 16  ;;  %s772_s19 = scalar_lea.vmem %s526_s17, 32 }
  0x14   :  { %763 = vset.pattern.permute.xlu1 %v793_v43  ;;  %p769_p0 = scmp.ne.s32.totalorder %s526_s17, %s768_s18  ;;  %p773_p1 = scmp.lt.s32.totalorder %s526_s17, %s526_s17 }
  0x15   :  { %699 = vmatpush3.bf16.xpose.msk.msra.mxu0 %vm839_vm1, %v694_v13  ;;  %762 = vset.pattern.permute.xlu0 %v793_v43  ;;  %p774_p2 = scmp.lt.s32.totalorder %s772_s19, %s768_s18 }
  0x16   :  { %702 = vmatprep.subr.msk.bf16.mxu0 %vm839_vm1, %v700_v20  ;;  %289 = vperm.xlu1 %763, %v877_v14  }
  0x17   :  { %285 = vperm.xlu0 %762, %v865_v11   ;;  %p775_p3 = por %p774_p2, %p773_p1 }
  0x19   :  { %p776_p4 = pnand %p775_p3, %p769_p0 }
  0x1a   :  { %293 = vperm.xlu1 %763, %v870_v12  }
  0x1b   :  { %297 = vperm.xlu0 %762, %v40_v15  }
  0x1d   :  { %705 = vmatpush3.bf16.xpose.msk.msra.mxu0 %vm839_vm1, %v700_v20  ;;  %v283_v20 = vld [vmem:[%s1027_s2 + $0x18] sm:$0xff] }
  0x1e   :  { %708 = vmatprep.subr.msk.bf16.mxu0 %vm839_vm1, %v706_v25  ;;  %764 = vset.pattern.permute.xlu1 %v794_v22 }
  0x1f   :  { %765 = vset.pattern.permute.xlu0 %v794_v22  ;;  %405 = vperm.xlu1 %764, %v865_v11  }
  0x20   :  { %409 = vperm.xlu0 %765, %v877_v14  }
  0x23   :  { %766 = vset.pattern.permute.xlu1 %v795_v24 }
  0x24   :  { %496 = vperm.xlu1 %766, %v865_v11  }
  0x25   :  { %711 = vmatpush3.bf16.xpose.msk.msra.mxu0 %vm839_vm1, %v706_v25  ;;  %v796_v25 = vmov 4  }
  0x26   :  { %714 = vmatprep.subr.msk.bf16.mxu0 %vm839_vm1, %v712_v28  ;;  %767 = vset.pattern.permute.xlu0 %v796_v25 }
  0x27   :  { %514 = vperm.xlu0 %767, %v45_v23  }
  0x28   :  { %500 = vperm.xlu1 %766, %v877_v14  }
  0x2d   :  { %717 = vmatpush3.bf16.xpose.msk.msra.mxu0 %vm839_vm1, %v712_v28 }
  0x2e   :  { %720 = vmatprep.subr.msk.bf16.mxu0 %vm839_vm1, %v718_v31 }
  0x35   :  { %723 = vmatpush3.bf16.xpose.msk.msra.mxu0 %vm839_vm1, %v718_v31 }
  0x36   :  { %726 = vmatprep.subr.msk.bf16.mxu0 %vm839_vm1, %v724_v34 }
  0x3d   :  { %729 = vmatpush3.bf16.xpose.msk.msra.mxu0 %vm839_vm1, %v724_v34 }
  0x44   :  { %638 = vmatmul.mubr.msk.f32.vlgmr.msra.gmra.mrb[0].mxu0 %vm94_vm0, %v47_v35 }
  0x45   :  { %640 = vmatprep.mubr.msk.f32.mxu0 %vm94_vm0, %v48_v36 }
  0x48   :  { %641 = vmatmul.mubr.msk.f32.gmra.mrb[2].mxu0 %vm94_vm0, %v49_v37 }
  0x49   :  { %643 = vmatprep.mubr.msk.f32.mxu0 %vm94_vm0, %v50_v38 }
  0x4c   :  { %644 = vmatmul.mubr.msk.f32.gmra.mrb[4].mxu0 %vm94_vm0, %v51_v39 }
  0x4d   :  { %646 = vmatprep.mubr.msk.f32.mxu0 %vm94_vm0, %v52_v40 }
  0x50   :  { %647 = vmatmul.mubr.msk.f32.gmra.mrb[6].mxu0 %vm94_vm0, %v53_v41 }
  0x83   :  { %v67_v45 = vpop.permute.xlu1 %66 }
  0x84   :  { %v57_v44 = vpop.permute.xlu0 %56 }
  0x87   :  { %v72_v47 = vpop.permute.xlu1 %71 }
  0x88   :  { %v62_v46 = vpop.permute.xlu0 %61 }
  0x8b   :  { %v82_v57 = vpop.permute.xlu1 %81 }
  0x8c   :  { %v77_v60 = vpop.permute.xlu0 %76 }
  0x8f   :  { %v92_v5 = vpop.permute.xlu1 %91 }
  0x90   :  { %v87_v8 = vpop.permute.xlu0 %86 }
  0x95   :  { %v290_v27 = vpop.permute.xlu1 %289 }
  0x96   :  { %v286_v26 = vpop.permute.xlu0 %285 }
  0x99   :  { %v294_v36 = vpop.permute.xlu1 %293 }
  0x9a   :  { %v298_v33 = vpop.permute.xlu0 %297 }
  0x9e   :  { %v406_v43 = vpop.permute.xlu1 %405 }
 0x117   :  { %v639_v48 = vpop.f32.mrb[0].mxu0 }
 0x118   :  { %v239_v49 = vadd.f32 %v639_v48, %v62_v46  ;;  %v233_v50 = vpop.f32.mrb[1].mxu0 }
 0x119   :  { %v234_v51 = vadd.f32 %v233_v50, %v57_v44  ;;  %v497_v44 = vpop.permute.xlu1 %496 }
 0x11a   :  { %v273_v52 = vmax.f32 %v239_v49, 0.0 }
 0x11b   :  { %v272_v53 = vmax.f32 %v234_v51, 0.0  ;;  %v642_v54 = vpop.f32.mrb[2].mxu0 }
 0x11c   :  { %v249_v55 = vadd.f32 %v642_v54, %v72_v47  ;;  %v243_v56 = vpop.f32.mrb[3].mxu0 }
 0x11d   :  { %v244_v58 = vadd.f32 %v243_v56, %v67_v45  ;;  %v730_v59 = vpack.c.bf16 %v273_v52, %v272_v53  ;;  %v410_v45 = vpop.permute.xlu0 %409  ;;  %v501_v52 = vpop.permute.xlu1 %500 }
 0x11e   :  { %v275_v61 = vmax.f32 %v249_v55, 0.0 }
 0x11f   :  { %v274_v62 = vmax.f32 %v244_v58, 0.0  ;;  %v645_v63 = vpop.f32.mrb[4].mxu0  ;;  %731 = vmatprep.subr.bf16.mxu1 %v730_v59 }
 0x120   :  { %v259_v0 = vadd.f32 %v645_v63, %v82_v57  ;;  %v253_v1 = vpop.f32.mrb[5].mxu0  ;;  %733 = vmatpush3.bf16.msra.mxu1 %v730_v59 }
 0x121   :  { %v734_v2 = vpack.c.bf16 %v275_v61, %v274_v62  ;;  %v254_v3 = vadd.f32 %v253_v1, %v77_v60  ;;  %v515_v61 = vpop.permute.xlu0 %514 }
 0x122   :  { %v277_v4 = vmax.f32 %v259_v0, 0.0 }
 0x123   :  { %v276_v6 = vmax.f32 %v254_v3, 0.0  ;;  %v648_v7 = vpop.f32.mrb[6].mxu0  ;;  %735 = vmatprep.subr.bf16.mxu1 %v734_v2 }
 0x124   :  { %v269_v9 = vadd.f32 %v648_v7, %v92_v5  ;;  %v263_v10 = vpop.f32.mrb[7].mxu0  ;;  %737 = vmatpush3.bf16.msra.mxu1 %v734_v2 }
 0x125   :  { %v738_v12 = vpack.c.bf16 %v277_v4, %v276_v6  ;;  %v264_v13 = vadd.f32 %v263_v10, %v87_v8 }
 0x126   :  { %v279_v15 = vmax.f32 %v269_v9, 0.0 }
 0x127   :  { %v278_v16 = vmax.f32 %v264_v13, 0.0  ;;  %739 = vmatprep.subr.bf16.mxu1 %v738_v12 }
 0x128   :  { %741 = vmatpush3.bf16.msra.mxu1 %v738_v12 }
 0x129   :  { %v742_v17 = vpack.c.bf16 %v279_v15, %v278_v16 }
 0x12b   :  { %743 = vmatprep.subr.bf16.mxu1 %v742_v17 }
 0x12c   :  { %745 = vmatpush3.bf16.msra.mxu1 %v742_v17 }
 0x12f   :  { %666 = vmatmul.mubr.msk.f32.vlgmr.msra.gmra.mrb[0].mxu1 %vm300_vm2, %v281_v18 }
 0x130   :  { %668 = vmatprep.mubr.msk.f32.mxu1 %vm300_vm2, %v282_v19 }
 0x133   :  { %669 = vmatmul.mubr.msk.f32.gmra.mrb[2].mxu1 %vm300_vm2, %v283_v20 }
 0x134   :  { %679 = vmatprep.mubr.msk.f32.mxu1 %vm94_vm0, %v402_v21 }
 0x202   :  { %v667_v28 = vpop.f32.mrb[0].mxu1 }
 0x203   :  { %v385_v29 = vadd.f32 %v667_v28, %v290_v27  ;;  %v379_v30 = vpop.f32.mrb[1].mxu1 }
 0x204   :  { %v380_v31 = vadd.f32 %v379_v30, %v286_v26 }
 0x205   :  { %v399_v32 = vmax.f32 %v385_v29, 0.0 }
 0x206   :  { %v398_v34 = vmax.f32 %v380_v31, 0.0  ;;  %v670_v35 = vpop.f32.mrb[2].mxu1 }
 0x207   :  { %v395_v37 = vadd.f32 %v670_v35, %v298_v33  ;;  %v389_v38 = vpop.f32.mrb[3].mxu1 }
 0x208   :  { %v746_v39 = vpack.c.bf16 %v399_v32, %v398_v34  ;;  %v390_v40 = vadd.f32 %v389_v38, %v294_v36 }
 0x209   :  { %v401_v41 = vmax.f32 %v395_v37, 0.0 }
 0x20a   :  { %v400_v11 = vmax.f32 %v390_v40, 0.0  ;;  %747 = vmatprep.subr.bf16.mxu1 %v746_v39 }
 0x20b   :  { %749 = vmatpush3.bf16.msra.mxu1 %v746_v39 }
 0x20c   :  { %v750_v14 = vpack.c.bf16 %v401_v41, %v400_v11 }
 0x20e   :  { %751 = vmatprep.subr.bf16.mxu1 %v750_v14 }
 0x20f   :  { %753 = vmatpush3.bf16.msra.mxu1 %v750_v14 }
 0x212   :  { %680 = vmatmul.mubr.msk.f32.vlgmr.msra.gmra.mrb[4].mxu1 %vm94_vm0, %v403_v42 }
 0x2e5   :  { %v681_v46 = vpop.f32.mrb[4].mxu1 }
 0x2e6   :  { %v490_v47 = vadd.f32 %v681_v46, %v410_v45  ;;  %v484_v48 = vpop.f32.mrb[5].mxu1 }
 0x2e7   :  { %v485_v49 = vadd.f32 %v484_v48, %v406_v43 }
 0x2e8   :  { %v494_v50 = vmax.f32 %v490_v47, 0.0 }
 0x2e9   :  { %v493_v51 = vmax.f32 %v485_v49, 0.0 }
 0x2ea   :  { %v504_v53 = vmul.f32 %v501_v52, %v494_v50 }
 0x2eb   :  { %v503_v54 = vmul.f32 %v497_v44, %v493_v51 }
 0x2ed   :  { %v505_v55 = vadd.f32 %v504_v53, %v503_v54 }
 0x2ef   :  { %v506_v56 = vrot.slane %v505_v55, 4 }
 0x2f1   :  { %v507_v57 = vadd.f32 %v506_v56, %v505_v55 }
 0x2f3   :  { %v508_v58 = vrot.slane %v507_v57, 2 }
 0x2f5   :  { %v509_v59 = vadd.f32 %v508_v58, %v507_v57 }
 0x2f7   :  { %v510_v60 = vrot.slane %v509_v59, 1 }
 0x2f9   :  { %v511_v62 = vadd.f32 %v510_v60, %v509_v59 }
 0x2fb   :  { %v517_v63 = vadd.f32 %v515_v61, %v511_v62 }
 0x2fd   :  { %518 = vst [vmem:[#allocation2] sm:$0x1] %v517_v63 }
 0x2fe   :  { %779 = shalt.err (!%p776_p4)
}
 0x2ff   :  { %s780_s0 = scalar_lea.hbm %s1030_s5, 16 }
 0x300   :  { %p781_p5 = scmp.ne.s32.totalorder %s1030_s5, %s780_s0  ;;  %p784_p6 = scmp.lt.u32.totalorder %s780_s0, %s1030_s5 }
 0x302   :  { %p786_p7 = pnand %p784_p6, %p781_p5 }
 0x304   :  { %789 = shalt.err (!%p786_p7)
}
 0x305   :  { %528 = dma.vmem_to_hbm [thread:$0]  %s526_s17, 16, %s1030_s5, [#allocation3]  }
 0x306   :  { %790 = dma.done.wait [#allocation3], 16  }
 0x307   :  { %791 = vsyncadd [#allocation3], 4294967280 }
 0x308   :  { %532 = vsyncpa [#allocation3], 1 }

</bundles_post_ra>
